<compile_context>
chip_gen: v7x
topology: tpu7x:2x2x1
jax: 0.10.0
libtpu: 0.0.40
codegen_flags: <defaults>
</compile_context>

<pallas_src>
import math
import functools

import jax
import jax.numpy as jnp
from jax.experimental import pallas as pl
from jax.experimental.pallas import tpu as pltpu


# Finite sentinel: exp(NEG_INF - m) underflows to exactly 0, and there is no
# exp(-inf - -inf) = NaN hazard if a block ever ends up fully masked.
NEG_INF = -1e30


def _round_up(x, m):
    return ((x + m - 1) // m) * m


def _pick_tile(n, target, align):
    """Largest tile t <= target with n % t == 0 and t % align == 0.

    Falls back to the full extent n (always a legal last-two block dim).  This
    removes every wrapper-side jnp.pad (each pad is a full extra HBM read+write
    of the operand before the kernel even starts)."""
    if n <= target:
        return n
    start = target - (target % align)
    for t in range(start, 0, -align):
        if n % t == 0:
            return t
    return n


@functools.lru_cache()
def _vmem_limit_bytes():
    """Generation-gated scoped-VMEM limit.

    v5e/v6e (128 MiB physical) -> 64 MiB, v7x (64 MiB physical) -> 32 MiB.
    Falls back to a conservative 32 MiB if the query fails."""
    limit = 32 * 1024 * 1024
    try:
        cap = pltpu.get_tpu_info().vmem_capacity_bytes
        limit = max(limit, min(cap // 2, 96 * 1024 * 1024))
    except Exception:
        pass
    return limit


# ----------------------------------------------------------------------------
# Kernel 1: tiled dense (nn.Linear) --  y = x @ W^T + b  (W passed pre-transposed)
# ----------------------------------------------------------------------------
def _linear_kernel(x_ref, w_ref, b_ref, o_ref, acc_ref):
    k = pl.program_id(2)

    @pl.when(k == 0)
    def _init():
        acc_ref[...] = jnp.zeros_like(acc_ref)

    # bf16 MXU operands, f32 accumulation (native MXU path on v5e/v6e/v7x).
    acc_ref[...] += jnp.dot(x_ref[...].astype(jnp.bfloat16),
                            w_ref[...].astype(jnp.bfloat16),
                            preferred_element_type=jnp.float32)

    @pl.when(k == pl.num_programs(2) - 1)
    def _finalize():
        o_ref[...] = (acc_ref[...] + b_ref[...].astype(jnp.float32)).astype(o_ref.dtype)


def pallas_linear(x, w_t, b, *, out_dtype=None, tm=256, tn=512, tk=512):
    """x: (M, K), w_t: (K, N), b: (N,) -> (M, N) in out_dtype (default x.dtype)."""
    M, K = x.shape
    N = w_t.shape[1]
    out_dtype = out_dtype or x.dtype

    # Divisor-picked tiles: no padding, no in-kernel masking needed.
    # (For v7x megacore, make sure (M/tm)*(N/tn) >= 2 for realistic shapes.)
    tm = _pick_tile(M, tm, 8)
    tn = _pick_tile(N, tn, 128)
    tk = _pick_tile(K, tk, 128)

    b2 = b.reshape(1, N)
    grid = (M // tm, N // tn, K // tk)

    return pl.pallas_call(
        _linear_kernel,
        out_shape=jax.ShapeDtypeStruct((M, N), out_dtype),
        grid=grid,
        in_specs=[
            pl.BlockSpec((tm, tk), lambda i, j, k: (i, k)),
            pl.BlockSpec((tk, tn), lambda i, j, k: (k, j)),
            pl.BlockSpec((1, tn), lambda i, j, k: (0, j)),
        ],
        out_specs=pl.BlockSpec((tm, tn), lambda i, j, k: (i, j)),
        scratch_shapes=[pltpu.VMEM((tm, tn), jnp.float32)],
        compiler_params=pltpu.CompilerParams(
            dimension_semantics=("parallel", "parallel", "arbitrary"),
            vmem_limit_bytes=_vmem_limit_bytes()),
    )(x, w_t, b2)


# ----------------------------------------------------------------------------
# Kernel 2: flash-style attention core, token-major layout (B, S, H*d_k).
#           Grid = (B, Sq blocks, KV blocks); KV axis streamed with online softmax.
#           q is expected PRE-SCALED by 1/sqrt(d_k) (folded into the Q projection).
# ----------------------------------------------------------------------------
def _flash_attn_kernel(q_ref, k_ref, v_ref, o_ref, m_sc, l_sc, acc_sc, *,
                       num_heads, d_k, sk_valid, tkv, mask_kv):
    kv = pl.program_id(2)

    @pl.when(kv == 0)
    def _init():
        m_sc[...] = jnp.full_like(m_sc, NEG_INF)
        l_sc[...] = jnp.zeros_like(l_sc)
        acc_sc[...] = jnp.zeros_like(acc_sc)

    q = q_ref[0]          # (tq, dim)   bf16, pre-scaled by 1/sqrt(d_k)
    k = k_ref[0]          # (tkv, dim)  bf16
    v = v_ref[0]          # (tkv, dim)  bf16

    if mask_kv:
        # KV tail handled by the cdiv grid: boundary block data past Sk is
        # unspecified -> mask scores with a finite sentinel and zero the V rows.
        col = kv * tkv + jax.lax.broadcasted_iota(jnp.int32, (1, tkv), 1)
        valid_col = col < sk_valid                                       # (1, tkv)
        row = kv * tkv + jax.lax.broadcasted_iota(jnp.int32, (tkv, 1), 0)
        valid_row = row < sk_valid                                       # (tkv, 1)
        v = jnp.where(valid_row, v, jnp.zeros_like(v))

    # TODO(synk): batch the per-head dots into a single (H, tq, d_k) dot_general
    # once the head-major relayout is verified to lower on the target Mosaic.
    for h in range(num_heads):
        lo, hi = h * d_k, (h + 1) * d_k
        qh, kh, vh = q[:, lo:hi], k[:, lo:hi], v[:, lo:hi]

        # q @ k^T without materializing a transpose: contract d_k of both operands.
        s = jax.lax.dot_general(qh, kh, (((1,), (1,)), ((), ())),
                                preferred_element_type=jnp.float32)      # (tq, tkv)
        if mask_kv:
            s = jnp.where(valid_col, s, NEG_INF)

        m_prev = m_sc[h]                                   # (tq, 1)
        l_prev = l_sc[h]                                   # (tq, 1)

        m_new = jnp.maximum(m_prev, jnp.max(s, axis=-1, keepdims=True))
        alpha = jnp.exp(m_prev - m_new)                    # (tq, 1)
        p = jnp.exp(s - m_new)                             # (tq, tkv), f32
        if mask_kv:
            p = jnp.where(valid_col, p, 0.0)

        l_sc[h] = alpha * l_prev + jnp.sum(p, axis=-1, keepdims=True)
        acc_sc[h] = alpha * acc_sc[h] + jnp.dot(p.astype(vh.dtype), vh,
                                                preferred_element_type=jnp.float32)
        m_sc[h] = m_new

    @pl.when(kv == pl.num_programs(2) - 1)
    def _finalize():
        # Per-head stores into the lane-dense (tq, H*d_k) output slab: no concat.
        for h in range(num_heads):
            inv_l = pl.reciprocal(l_sc[h], approx=True)    # EUP slot, ~free
            o_ref[0, :, h * d_k:(h + 1) * d_k] = (acc_sc[h] * inv_l).astype(o_ref.dtype)


def pallas_flash_attention(q_arr, k_arr, v_arr, num_heads, dim, *,
                           q_col=0, k_col=0, v_col=0, tq=256, tkv=256):
    """q_arr: (B, Sq, Dq), k_arr/v_arr: (B, Sk, Dk) -> (B, Sq, dim) token-major.

    The *_col arguments are column-BLOCK indices (block width = dim) along the
    last axis, so a fused (B, S, 3*dim) QKV tensor can be consumed in place.
    q must already carry the 1/sqrt(d_k) scale."""
    B, Sq = q_arr.shape[0], q_arr.shape[1]
    Sk = k_arr.shape[1]
    d_k = dim // num_heads
    out_dtype = q_arr.dtype

    tq = min(tq, _round_up(Sq, 8))
    tkv = min(tkv, _round_up(Sk, 8))
    # v7x has 2 TensorCores: make sure the parallel axes give >= 2 iterations.
    if B * pl.cdiv(Sq, tq) < 2 and Sq > 8:
        tq = _round_up(pl.cdiv(Sq, 2), 8)

    n_q = pl.cdiv(Sq, tq)
    n_kv = pl.cdiv(Sk, tkv)
    mask_kv = (Sk % tkv) != 0

    kernel = functools.partial(
        _flash_attn_kernel, num_heads=num_heads, d_k=d_k,
        sk_valid=Sk, tkv=tkv, mask_kv=mask_kv)

    grid = (B, n_q, n_kv)
    return pl.pallas_call(
        kernel,
        out_shape=jax.ShapeDtypeStruct((B, Sq, dim), out_dtype),
        grid=grid,
        in_specs=[
            pl.BlockSpec((1, tq, dim), lambda b, qi, ki, c=q_col: (b, qi, c)),
            pl.BlockSpec((1, tkv, dim), lambda b, qi, ki, c=k_col: (b, ki, c)),
            pl.BlockSpec((1, tkv, dim), lambda b, qi, ki, c=v_col: (b, ki, c)),
        ],
        out_specs=pl.BlockSpec((1, tq, dim), lambda b, qi, ki: (b, qi, 0)),
        scratch_shapes=[
            pltpu.VMEM((num_heads, tq, 1), jnp.float32),    # running max m
            pltpu.VMEM((num_heads, tq, 1), jnp.float32),    # running sum l
            pltpu.VMEM((num_heads, tq, d_k), jnp.float32),  # unnormalized acc
        ],
        compiler_params=pltpu.CompilerParams(
            dimension_semantics=("parallel", "parallel", "arbitrary"),
            vmem_limit_bytes=_vmem_limit_bytes()),
    )(q_arr, k_arr, v_arr)


# ----------------------------------------------------------------------------
# Module-level forward (parameter plumbing in JAX, hot paths in Pallas)
# ----------------------------------------------------------------------------
def init_attention_params(key, dim):
    """nn.Linear-shaped params: weight (out, in), bias (out,)."""
    ks = jax.random.split(key, 8)
    bound = 1.0 / math.sqrt(dim)

    def lin(kw, kb):
        w = jax.random.uniform(kw, (dim, dim), jnp.float32, -bound, bound)
        b = jax.random.uniform(kb, (dim,), jnp.float32, -bound, bound)
        return w, b

    wq, bq = lin(ks[0], ks[1])
    wk, bk = lin(ks[2], ks[3])
    wv, bv = lin(ks[4], ks[5])
    wo, bo = lin(ks[6], ks[7])
    return dict(wq=wq, bq=bq, wk=wk, bk=bk, wv=wv, bv=bv, wo=wo, bo=bo)


def attention_forward(params, q, k, v, num_heads, *, tq=256, tkv=256):
    """Matches Attention.forward in eval mode (dropout = identity)."""
    B, Sq, dim = q.shape
    Sk = k.shape[1]
    d_k = dim // num_heads
    scale = 1.0 / math.sqrt(d_k)
    act_dtype = jnp.bfloat16   # projection activations round-trip HBM in bf16

    # Fold the 1/sqrt(d_k) softmax scale into the Q projection (free at call
    # time; removes the per-KV-step rescale of the q block inside the kernel).
    wq_s = params["wq"] * scale
    bq_s = params["bq"] * scale

    fuse_qkv = (q is k) and (k is v) and (dim % 128 == 0)
    if fuse_qkv:
        # Self-attention: one fused QKV projection (x read from HBM once, one
        # launch); the attention kernel consumes (B, S, 3*dim) directly through
        # column-block index maps, so no slicing copies.
        w_qkv = jnp.concatenate([wq_s.T, params["wk"].T, params["wv"].T], axis=1)
        b_qkv = jnp.concatenate([bq_s, params["bk"], params["bv"]])
        qkv = pallas_linear(q.reshape(B * Sq, dim), w_qkv, b_qkv,
                            out_dtype=act_dtype).reshape(B, Sq, 3 * dim)
        ctx = pallas_flash_attention(qkv, qkv, qkv, num_heads, dim,
                                     q_col=0, k_col=1, v_col=2, tq=tq, tkv=tkv)
    else:
        qp = pallas_linear(q.reshape(B * Sq, dim), wq_s.T, bq_s,
                           out_dtype=act_dtype).reshape(B, Sq, dim)
        kp = pallas_linear(k.reshape(B * Sk, dim), params["wk"].T, params["bk"],
                           out_dtype=act_dtype).reshape(B, Sk, dim)
        vp = pallas_linear(v.reshape(B * Sk, dim), params["wv"].T, params["bv"],
                           out_dtype=act_dtype).reshape(B, Sk, dim)
        ctx = pallas_flash_attention(qp, kp, vp, num_heads, dim, tq=tq, tkv=tkv)

    # TODO(synk): training-mode dropout on the attention weights (pltpu.prng_*).
    out = pallas_linear(ctx.reshape(B * Sq, dim), params["wo"].T, params["bo"],
                        out_dtype=q.dtype)
    return out.reshape(B, Sq, dim)


# Pure-JAX f32 reference (matches the PyTorch module in eval mode).
def attention_forward_ref(params, q, k, v, num_heads):
    B, Sq, dim = q.shape
    Sk = k.shape[1]
    d_k = dim // num_heads
    qp = q @ params["wq"].T + params["bq"]
    kp = k @ params["wk"].T + params["bk"]
    vp = v @ params["wv"].T + params["bv"]
    qh = qp.reshape(B, Sq, num_heads, d_k).transpose(0, 2, 1, 3)
    kh = kp.reshape(B, Sk, num_heads, d_k).transpose(0, 2, 1, 3)
    vh = vp.reshape(B, Sk, num_heads, d_k).transpose(0, 2, 1, 3)
    s = jnp.einsum("bhqd,bhkd->bhqk", qh, kh) / math.sqrt(d_k)
    a = jax.nn.softmax(s, axis=-1)
    attn = jnp.einsum("bhqk,bhkd->bhqd", a, vh)
    concat = attn.transpose(0, 2, 1, 3).reshape(B, Sq, dim)
    return concat @ params["wo"].T + params["bo"]


def _run_case(B, Sq, Sk, dim, num_heads, *, self_attn=False, seed=0,
              atol=3e-2, rtol=3e-2, **attn_kwargs):
    key = jax.random.PRNGKey(seed)
    kp_, kq, kk, kv = jax.random.split(key, 4)
    params = init_attention_params(kp_, dim)
    if self_attn:
        assert Sq == Sk
        q = k = v = jax.random.normal(kq, (B, Sq, dim), jnp.float32)
    else:
        q = jax.random.normal(kq, (B, Sq, dim), jnp.float32)
        k = jax.random.normal(kk, (B, Sk, dim), jnp.float32)
        v = jax.random.normal(kv, (B, Sk, dim), jnp.float32)

    out = attention_forward(params, q, k, v, num_heads, **attn_kwargs)
    out = jax.block_until_ready(out)

    ref = attention_forward_ref(params, q, k, v, num_heads)
    assert out.shape == (B, Sq, dim)
    max_err = float(jnp.max(jnp.abs(out - ref)))
    assert jnp.allclose(out, ref, atol=atol, rtol=rtol), (
        f"mismatch vs reference (B={B}, Sq={Sq}, Sk={Sk}, dim={dim}, "
        f"H={num_heads}, self_attn={self_attn}): max |err| = {max_err}")


if __name__ == "__main__":
    # Small cross-attention shape matching typical module usage (dim=32, H=4).
    _run_case(B=2, Sq=8, Sk=8, dim=32, num_heads=4, seed=0)
    # Self-attention: fused QKV projection, multi-block flash path, masked KV
    # tail via the cdiv grid (144 % 128 != 0), bf16 activations end-to-end.
    _run_case(B=2, Sq=144, Sk=144, dim=256, num_heads=4, self_attn=True,
              seed=1, tkv=128)
    # Cross-attention with Sq != Sk, more heads, masked KV tail, unfused path.
    _run_case(B=2, Sq=72, Sk=136, dim=256, num_heads=8, seed=2, tkv=128)

    print("KERNEL_OK")
</pallas_src>

<mosaic_0001>
module attributes {stable_mosaic.version = 11 : i64} {
  func.func @_linear_kernel(%arg0: i32, %arg1: i32, %arg2: i32, %arg3: memref<16x32xf32, #tpu.memory_space<vmem>>, %arg4: memref<32x32xf32, #tpu.memory_space<vmem>>, %arg5: memref<1x32xf32, #tpu.memory_space<vmem>>, %arg6: memref<16x32xbf16, #tpu.memory_space<vmem>>, %arg7: memref<16x32xf32, #tpu.memory_space<vmem>>) attributes {dimension_semantics = [#tpu.dimension_semantics<parallel>, #tpu.dimension_semantics<parallel>, #tpu.dimension_semantics<arbitrary>], iteration_bounds = array<i64: 1, 1, 1>, scalar_prefetch = 0 : i64, scratch_operands = 1 : i64, tpu.core_type = #tpu.core_type<tc>, window_params = [{transform_indices = @transform_0, window_bounds = array<i64: 16, 32>}, {transform_indices = @transform_1, window_bounds = array<i64: 32, 32>}, {transform_indices = @transform_2, window_bounds = array<i64: 1, 32>}, {transform_indices = @transform_3, window_bounds = array<i64: 16, 32>}]} {
    %c0_i32 = arith.constant 0 : i32
    %0 = arith.cmpi eq, %arg2, %c0_i32 : i32
    %1 = arith.extui %0 : i1 to i32
    %c0_i32_0 = arith.constant 0 : i32
    %2 = arith.cmpi ne, %1, %c0_i32_0 : i32
    scf.if %2 {
      %cst_10 = arith.constant 0.000000e+00 : f32
      %14 = vector.broadcast %cst_10 : f32 to vector<16x32xf32>
      %c0_11 = arith.constant 0 : index
      %c0_12 = arith.constant 0 : index
      %15 = vector.load %arg7[%c0_11, %c0_12] : memref<16x32xf32, #tpu.memory_space<vmem>>, vector<16x32xf32>
      tpu.vector_store %arg7[%c0_11, %c0_12], %14 {strides = array<i32>} : memref<16x32xf32, #tpu.memory_space<vmem>>, vector<16x32xf32>,
    } else {
    }
    %c0 = arith.constant 0 : index
    %c0_1 = arith.constant 0 : index
    %3 = vector.load %arg7[%c0, %c0_1] : memref<16x32xf32, #tpu.memory_space<vmem>>, vector<16x32xf32>
    %c0_2 = arith.constant 0 : index
    %c0_3 = arith.constant 0 : index
    %4 = vector.load %arg3[%c0_2, %c0_3] : memref<16x32xf32, #tpu.memory_space<vmem>>, vector<16x32xf32>
    %5 = arith.truncf %4 : vector<16x32xf32> to vector<16x32xbf16>
    %c0_4 = arith.constant 0 : index
    %c0_5 = arith.constant 0 : index
    %6 = vector.load %arg4[%c0_4, %c0_5] : memref<32x32xf32, #tpu.memory_space<vmem>>, vector<32x32xf32>
    %7 = arith.truncf %6 : vector<32x32xf32> to vector<32x32xbf16>
    %cst = arith.constant dense<0.000000e+00> : vector<16x32xf32>
    %8 = tpu.matmul %5, %7, %cst {dimension_numbers = #tpu.dot_dimension_numbers<[1], [0], [0], [1], [0, 0, 1, 1], [], []>} : vector<16x32xbf16>, vector<32x32xbf16>, vector<16x32xf32> -> vector<16x32xf32>
    %9 = arith.addf %3, %8 : vector<16x32xf32>
    %c0_6 = arith.constant 0 : index
    %c0_7 = arith.constant 0 : index
    %10 = vector.load %arg7[%c0_6, %c0_7] : memref<16x32xf32, #tpu.memory_space<vmem>>, vector<16x32xf32>
    tpu.vector_store %arg7[%c0_6, %c0_7], %9 {strides = array<i32>} : memref<16x32xf32, #tpu.memory_space<vmem>>, vector<16x32xf32>,
    %c0_i32_8 = arith.constant 0 : i32
    %11 = arith.cmpi eq, %arg2, %c0_i32_8 : i32
    %12 = arith.extui %11 : i1 to i32
    %c0_i32_9 = arith.constant 0 : i32
    %13 = arith.cmpi ne, %12, %c0_i32_9 : i32
    scf.if %13 {
      %c0_10 = arith.constant 0 : index
      %c0_11 = arith.constant 0 : index
      %14 = vector.load %arg7[%c0_10, %c0_11] : memref<16x32xf32, #tpu.memory_space<vmem>>, vector<16x32xf32>
      %c0_12 = arith.constant 0 : index
      %c0_13 = arith.constant 0 : index
      %15 = vector.load %arg5[%c0_12, %c0_13] : memref<1x32xf32, #tpu.memory_space<vmem>>, vector<1x32xf32>
      %16 = vector.broadcast %15 : vector<1x32xf32> to vector<16x32xf32>
      %17 = arith.addf %14, %16 : vector<16x32xf32>
      %18 = arith.truncf %17 : vector<16x32xf32> to vector<16x32xbf16>
      %c0_14 = arith.constant 0 : index
      %c0_15 = arith.constant 0 : index
      %19 = vector.load %arg6[%c0_14, %c0_15] : memref<16x32xbf16, #tpu.memory_space<vmem>>, vector<16x32xbf16>
      tpu.vector_store %arg6[%c0_14, %c0_15], %18 {strides = array<i32>} : memref<16x32xbf16, #tpu.memory_space<vmem>>, vector<16x32xbf16>,
    } else {
    }
    return
  }
  func.func @transform_0(%arg0: i32, %arg1: i32, %arg2: i32) -> (i32, i32) {
    %c0_i32 = arith.constant 0 : i32
    return %arg0, %arg2 : i32, i32
  }
  func.func @transform_1(%arg0: i32, %arg1: i32, %arg2: i32) -> (i32, i32) {
    %c0_i32 = arith.constant 0 : i32
    return %arg2, %arg1 : i32, i32
  }
  func.func @transform_2(%arg0: i32, %arg1: i32, %arg2: i32) -> (i32, i32) {
    %c0_i32 = arith.constant 0 : i32
    %c0_i32_0 = arith.constant 0 : i32
    return %c0_i32, %arg1 : i32, i32
  }
  func.func @transform_3(%arg0: i32, %arg1: i32, %arg2: i32) -> (i32, i32) {
    %c0_i32 = arith.constant 0 : i32
    return %arg0, %arg1 : i32, i32
  }
}

</mosaic_0001>

<bundles_post_ra>
// kernel: tpu_custom_call.1
= control target key start
LH: loop header
LB: loop body
LE: loop exit
PB: predicated region body
PF: predicated region fallthrough
CT: control target
= control target key end

     0   :  { %8 = vsyncpa [#allocation4], 0  ;;  %s325_s0 = inlined_call_operand.hbm [shape: f32[16,32], index: 0, kind: input, shape index: {}]   ;;  %s326_s1 = inlined_call_operand.hbm [shape: f32[32,32], index: 1, kind: input, shape index: {}]   ;;  %s327_s2 = inlined_call_operand.vmem [shape: f32[1,32], index: 2, kind: input, shape index: {}]   ;;  %s328_s3 = inlined_call_operand.hbm [shape: bf16[16,32], index: 3, kind: output, shape index: {}]  }
   0x1   :  { %9 = vsyncpa [#allocation7], 0 }
   0x2   :  { %10 = vsyncpa [#allocation5], 0  ;;  %s252_s12 = smov [#allocation3]   ;;  %s180_s16 = scalar_lea.hbm %s325_s0, 256 }
   0x3   :  { %s16_s13 = sshll.u32 %s252_s12, 4  ;;  %p181_p0 = scmp.ne.s32.totalorder %s325_s0, %s180_s16  ;;  %s17_s13 = int_to_ptr.vmem [resolvable:$true] %s16_s13 }
   0x4   :  { %p184_p1 = scmp.lt.u32.totalorder %s180_s16, %s325_s0 }
   0x6   :  { %p186_p2 = pnand %p184_p1, %p181_p0 }
   0x8   :  { %189 = shalt.err (!%p186_p2)
}
   0x9   :  { %s190_s21 = scalar_lea.vmem %s17_s13, 256  ;;  %p195_p4 = scmp.lt.s32.totalorder %s17_s13, %s17_s13 }
   0xa   :  { %p191_p3 = scmp.ne.s32.totalorder %s17_s13, %s190_s21  ;;  %p196_p5 = scmp.lt.s32.totalorder %s190_s21, %s190_s21 }
   0xc   :  { %p197_p6 = por %p196_p5, %p195_p4 }
   0xe   :  { %p198_p7 = pnand %p197_p6, %p191_p3 }
  0x10   :  { %201 = shalt.err (!%p198_p7)
}
  0x11   :  { %s253_s22 = smov 128   ;;  %s254_s23 = smov 8  }
  0x12   :  { %22 = dma.hbm_to_vmem [thread:$0]  %s325_s0, 256, %s17_s13, [#allocation4], %s253_s22, %s253_s22, %s254_s23  }
  0x13   :  { %s255_s26 = smov [#allocation6]   ;;  %s202_s30 = scalar_lea.hbm %s326_s1, 512 }
  0x14   :  { %s28_s27 = sshll.u32 %s255_s26, 4  ;;  %p203_p8 = scmp.ne.s32.totalorder %s326_s1, %s202_s30  ;;  %s29_s27 = int_to_ptr.vmem [resolvable:$true] %s28_s27 }
  0x15   :  { %p206_p9 = scmp.lt.u32.totalorder %s202_s30, %s326_s1 }
  0x17   :  { %p208_p10 = pnand %p206_p9, %p203_p8 }
  0x19   :  { %211 = shalt.err (!%p208_p10)
}
  0x1a   :  { %s212_s8 = scalar_lea.vmem %s29_s27, 512  ;;  %p217_p12 = scmp.lt.s32.totalorder %s29_s27, %s29_s27 }
  0x1b   :  { %p213_p11 = scmp.ne.s32.totalorder %s29_s27, %s212_s8  ;;  %p218_p13 = scmp.lt.s32.totalorder %s212_s8, %s212_s8 }
  0x1d   :  { %p219_p0 = por %p218_p13, %p217_p12 }
  0x1f   :  { %p220_p1 = pnand %p219_p0, %p213_p11 }
  0x21   :  { %223 = shalt.err (!%p220_p1)
}
  0x22   :  { %34 = dma.hbm_to_vmem [thread:$0]  %s326_s1, 512, %s29_s27, [#allocation7], %s253_s22, %s253_s22, %s254_s23  }
  0x23   :  { %246 = dma.done.wait [#allocation4], 256  }
  0x24   :  { %247 = vsyncadd [#allocation4], 4294967040 }
  0x25   :  { %248 = dma.done.wait [#allocation7], 512  }
  0x26   :  { %249 = vsyncadd [#allocation7], 4294966784  ;;  %vm48_vm0 = vcmask 261120   ;;  %v256_v0 = vmov 0.0   ;;  %vm257_vm1 = vmmov 0   ;;  %v56_v1 = vld [vmem:[#allocation6] sm:$0xff] }
  0x27   :  { %163 = vmatprep.subr.bf16.mxu0 %v256_v0  ;;  %167 = vmatprep.mubr.msk.bf16.mxu0 %vm257_vm1, %v256_v0  ;;  %49 = vst.msk [vmem:[#allocation2] sm:$0xff] %vm48_vm0, %v256_v0  ;;  %50 = vst.msk [vmem:[#allocation2 + $0x8] sm:$0xff] %vm48_vm0, %v256_v0  ;;  %v57_v2 = vld [vmem:[#allocation6 + $0x8] sm:$0xff]  ;;  %v58_v3 = vld [vmem:[#allocation6 + $0x10] sm:$0xff]  ;;  %s258_s11 = smov [#allocation8]   ;;  %vm133_vm2 = vcmask 257024  }
  0x28   :  { %v60_v4 = vpack.c.bf16 %v57_v2, %v56_v1  ;;  %v59_v5 = vld [vmem:[#allocation6 + $0x18] sm:$0xff]  ;;  %v53_v7 = vld [vmem:[#allocation3] sm:$0xff]  ;;  %v155_v18 = vld [vmem:[%s327_s2] ss:$0 sm:$0xff]  ;;  %s141_s12 = sshll.u32 %s258_s11, 4  ;;  %s142_s12 = int_to_ptr.vmem [resolvable:$true] %s141_s12 }
  0x29   :  { %v61_v6 = vpack.c.bf16 %v59_v5, %v58_v3  ;;  %v54_v8 = vld [vmem:[#allocation3 + $0x8] sm:$0xff]  ;;  %s224_s13 = scalar_lea.vmem %s142_s12, 128  ;;  %p229_p3 = scmp.lt.s32.totalorder %s142_s12, %s142_s12 }
  0x2a   :  { %164 = vmatpush3.bf16.msra.mxu0 %v60_v4  ;;  %v55_v9 = vpack.c.bf16 %v54_v8, %v53_v7  ;;  %p225_p2 = scmp.ne.s32.totalorder %s142_s12, %s224_s13  ;;  %p230_p4 = scmp.lt.s32.totalorder %s224_s13, %s224_s13 }
  0x2b   :  { %165 = vmatprep.subr.bf16.mxu0 %v256_v0 }
  0x2c   :  { %p231_p5 = por %p230_p4, %p229_p3 }
  0x2e   :  { %166 = vmatpush3.bf16.msra.mxu0 %v61_v6  ;;  %v51_v10 = vld [vmem:[#allocation2] sm:$0xff]  ;;  %v52_v12 = vld [vmem:[#allocation2 + $0x8] sm:$0xff]  ;;  %p232_p6 = pnand %p231_p5, %p225_p2 }
  0x31   :  { %168 = vmatmul.mubr.msk.bf16.vlgmr.msra.gmra.mrb[0].mxu0 %vm48_vm0, %v55_v9 }
 0x104   :  { %v100_v11 = vpop.f32.mrb[0].mxu0 }
 0x105   :  { %v107_v13 = vadd.f32 %v100_v11, %v51_v10  ;;  %v169_v14 = vpop.f32.mrb[1].mxu0 }
 0x106   :  { %v103_v15 = vpop.f32.mrb[2].mxu0 }
 0x107   :  { %109 = vst.msk [vmem:[#allocation2] sm:$0xff] %vm48_vm0, %v107_v13  ;;  %v108_v16 = vadd.f32 %v103_v15, %v52_v12  ;;  %v170_v17 = vpop.f32.mrb[3].mxu0 }
 0x109   :  { %110 = vst.msk [vmem:[#allocation2 + $0x8] sm:$0xff] %vm48_vm0, %v108_v16 }
 0x10e   :  { %v114_v19 = vld [vmem:[#allocation2] sm:$0xff] }
 0x10f   :  { %v123_v20 = vadd.f32 %v155_v18, %v114_v19 }
 0x110   :  { %v115_v21 = vld [vmem:[#allocation2 + $0x8] sm:$0xff] }
 0x111   :  { %v124_v22 = vadd.f32 %v155_v18, %v115_v21  ;;  %v158_v23 = vpack.c.bf16 %v123_v20, %v123_v20 }
 0x113   :  { %v159_v24 = vpack.c.bf16 %v124_v22, %v124_v22  ;;  %134 = vst.msk [vmem:[#allocation8] sm:$0xf] %vm133_vm2, %v158_v23 }
 0x115   :  { %135 = vst.msk [vmem:[#allocation8 + $0x4] sm:$0xf] %vm133_vm2, %v159_v24 }
 0x116   :  { %235 = shalt.err (!%p232_p6)
}
 0x117   :  { %s236_s15 = scalar_lea.hbm %s328_s3, 128 }
 0x118   :  { %p237_p7 = scmp.ne.s32.totalorder %s328_s3, %s236_s15  ;;  %p240_p8 = scmp.lt.u32.totalorder %s236_s15, %s328_s3 }
 0x11a   :  { %p242_p9 = pnand %p240_p8, %p237_p7 }
 0x11c   :  { %245 = shalt.err (!%p242_p9)
}
 0x11d   :  { %s259_s20 = smov 64   ;;  %s260_s21 = smov 4  }
 0x11e   :  { %147 = dma.vmem_to_hbm [thread:$0]  %s142_s12, 128, %s328_s3, [#allocation5], %s259_s20, %s259_s20, %s260_s21  }
 0x11f   :  { %250 = dma.done.wait [#allocation5], 128  }
 0x120   :  { %251 = vsyncadd [#allocation5], 4294967168 }
 0x121   :  { %151 = vsyncpa [#allocation4], 1 }
 0x122   :  { %152 = vsyncpa [#allocation7], 1 }
 0x123   :  { %153 = vsyncpa [#allocation5], 1 }

</bundles_post_ra>
